<compile_context>
chip_gen: v7x
topology: tpu7x:2x2x1
jax: 0.10.0
libtpu: 0.0.40
codegen_flags: <defaults>
</compile_context>

<pallas_src>
import functools

import jax
import jax.numpy as jnp
from jax.experimental import pallas as pl
from jax.experimental.pallas import tpu as pltpu

LOG_SIG_MAX = 2.0
LOG_SIG_MIN = -20.0


def _round_up(x, m):
    return (x + m - 1) // m * m


# ---------------------------------------------------------------------------
# Pallas kernel
# ---------------------------------------------------------------------------
def policy_kernel(state_ref, w1_ref, b1_ref, w2_ref, b2_ref, wh_ref, bh_ref,
                  out_ref, *, a_pad):
    x = state_ref[...]                                              # [tb, n_in]
    h = jnp.dot(x, w1_ref[...], preferred_element_type=jnp.float32) + b1_ref[...]
    h = jnp.maximum(h, 0.0)                                         # relu(linear1)
    h = jnp.dot(h, w2_ref[...], preferred_element_type=jnp.float32) + b2_ref[...]
    h = jnp.maximum(h, 0.0)                                         # relu(linear2)
    # fused mean|log_std head: one matmul into a single packed lane slab
    y = jnp.dot(h, wh_ref[...], preferred_element_type=jnp.float32) + bh_ref[...]
    # clamp only the log_std lanes (lane >= a_pad); mean lanes pass through
    lane = jax.lax.broadcasted_iota(jnp.int32, y.shape, 1)
    out_ref[...] = jnp.where(lane >= a_pad,
                             jnp.clip(y, LOG_SIG_MIN, LOG_SIG_MAX),
                             y)


# ---------------------------------------------------------------------------
# Wrapper: one-time parameter padding / head packing (pure glue) + pallas_call
# ---------------------------------------------------------------------------
def to_kernel_params(params, num_inputs, hidden_dim, num_actions):
    H_PAD = _round_up(hidden_dim, 128)
    # pack both heads into a single lane slab; 64-lane head offset when possible
    A_PAD = 64 if num_actions <= 64 else _round_up(num_actions, 128)
    OUT_PAD = 2 * A_PAD

    def pad_dense(w, b, k_pad, n_pad, n_off=0):
        # w: [out, in] (PyTorch layout), b: [out] -> zero-padded [k_pad, n_pad], [1, n_pad]
        wk = jnp.zeros((k_pad, n_pad), jnp.float32)
        wk = wk.at[: w.shape[1], n_off:n_off + w.shape[0]].set(w.T)
        bk = jnp.zeros((1, n_pad), jnp.float32).at[0, n_off:n_off + b.shape[0]].set(b)
        return wk, bk

    # linear1: natural K (= num_inputs, no per-call input padding), padded N
    w1k, b1k = pad_dense(*params["linear1"], num_inputs, H_PAD)
    w2k, b2k = pad_dense(*params["linear2"], H_PAD, H_PAD)
    # heads packed into one [H_PAD, 2*A_PAD] weight: mean at lanes [0:A), log_std at [A:2A)
    wmk, bmk = pad_dense(*params["mean_linear"], H_PAD, OUT_PAD, n_off=0)
    wsk, bsk = pad_dense(*params["log_std_linear"], H_PAD, OUT_PAD, n_off=A_PAD)
    whk = wmk + wsk
    bhk = bmk + bsk
    return (w1k, b1k, w2k, b2k, whk, bhk), (H_PAD, A_PAD)


def gaussian_policy_forward(state, kparams, dims, num_actions, *, batch_tile=1024):
    w1k, b1k, w2k, b2k, whk, bhk = kparams
    _H_PAD, A_PAD = dims
    OUT_PAD = 2 * A_PAD
    B, n_in = state.shape

    # batch padding: multiple-of-8 sublanes; cap tb at ~B/2 so large batches get
    # >= 2 grid steps (v7x megacore sharding), then whole number of tiles.
    B_pad = _round_up(B, 8)
    half = _round_up(max((B_pad + 1) // 2, 8), 8)
    tb = max(8, min(batch_tile, half))
    B_pad = _round_up(B_pad, tb)
    grid = (B_pad // tb,)

    # only the batch dim is padded (feature dim stays natural -> no 8x HBM blowup)
    if B_pad == B:
        xs = state
    else:
        xs = jnp.zeros((B_pad, n_in), state.dtype).at[:B].set(state)

    def resident(arr):   # full-array block, constant index -> stays in VMEM across tiles
        return pl.BlockSpec(arr.shape, lambda i: (0, 0))

    kernel = functools.partial(policy_kernel, a_pad=A_PAD)

    out = pl.pallas_call(
        kernel,
        out_shape=jax.ShapeDtypeStruct((B_pad, OUT_PAD), jnp.float32),
        grid=grid,
        in_specs=[pl.BlockSpec((tb, n_in), lambda i: (i, 0)),
                  resident(w1k), resident(b1k),
                  resident(w2k), resident(b2k),
                  resident(whk), resident(bhk)],
        out_specs=pl.BlockSpec((tb, OUT_PAD), lambda i: (i, 0)),
        compiler_params=pltpu.CompilerParams(dimension_semantics=("parallel",)),
    )(xs, w1k, b1k, w2k, b2k, whk, bhk)

    mean = out[:B, :num_actions]
    log_std = out[:B, A_PAD:A_PAD + num_actions]
    return mean, log_std


# ---------------------------------------------------------------------------
# Deterministic parameter construction (PyTorch init: xavier_uniform, zero bias)
# ---------------------------------------------------------------------------
def init_torch_params(key, num_inputs, hidden_dim, num_actions):
    ks = iter(jax.random.split(key, 4))

    def xavier(out_f, in_f):
        bound = float(jnp.sqrt(6.0 / (in_f + out_f)))
        w = jax.random.uniform(next(ks), (out_f, in_f), jnp.float32, -bound, bound)
        return w, jnp.zeros((out_f,), jnp.float32)

    return {
        "linear1": xavier(hidden_dim, num_inputs),
        "linear2": xavier(hidden_dim, hidden_dim),
        "mean_linear": xavier(num_actions, hidden_dim),
        "log_std_linear": xavier(num_actions, hidden_dim),
    }


# ---------------------------------------------------------------------------
# Pure-JAX reference replicating the PyTorch forward (validation only)
# ---------------------------------------------------------------------------
def reference_forward(params, state):
    def linear(x, wb):
        w, b = wb
        return x @ w.T + b

    x = jax.nn.relu(linear(state, params["linear1"]))
    x = jax.nn.relu(linear(x, params["linear2"]))
    mean = linear(x, params["mean_linear"])
    log_std = jnp.clip(linear(x, params["log_std_linear"]), LOG_SIG_MIN, LOG_SIG_MAX)
    return mean, log_std


# TODO(synk): GaussianPolicy.sample() (Normal.rsample / log_prob / tanh squash) is a
# stochastic method outside forward(); not kernelized here.

if __name__ == "__main__":
    NUM_INPUTS = 16
    HIDDEN_DIM = 32
    NUM_ACTIONS = 2
    BATCH = 4

    key = jax.random.PRNGKey(0)
    pkey, skey = jax.random.split(key)

    params = init_torch_params(pkey, NUM_INPUTS, HIDDEN_DIM, NUM_ACTIONS)
    kparams, dims = to_kernel_params(params, NUM_INPUTS, HIDDEN_DIM, NUM_ACTIONS)

    state = jax.random.normal(skey, (BATCH, NUM_INPUTS), jnp.float32)

    mean, log_std = gaussian_policy_forward(state, kparams, dims, NUM_ACTIONS)
    mean, log_std = jax.block_until_ready((mean, log_std))

    ref_mean, ref_log_std = reference_forward(params, state)

    assert mean.shape == (BATCH, NUM_ACTIONS) and log_std.shape == (BATCH, NUM_ACTIONS)
    assert jnp.allclose(mean, ref_mean, rtol=1e-5, atol=1e-5)
    assert jnp.allclose(log_std, ref_log_std, rtol=1e-5, atol=1e-5)
    print("KERNEL_OK")
</pallas_src>

<mosaic_0001>
module attributes {stable_mosaic.version = 11 : i64} {
  func.func @policy_kernel(%arg0: i32, %arg1: memref<8x16xf32, #tpu.memory_space<vmem>>, %arg2: memref<16x128xf32, #tpu.memory_space<vmem>>, %arg3: memref<1x128xf32, #tpu.memory_space<vmem>>, %arg4: memref<128x128xf32, #tpu.memory_space<vmem>>, %arg5: memref<1x128xf32, #tpu.memory_space<vmem>>, %arg6: memref<128x128xf32, #tpu.memory_space<vmem>>, %arg7: memref<1x128xf32, #tpu.memory_space<vmem>>, %arg8: memref<8x128xf32, #tpu.memory_space<vmem>>) attributes {dimension_semantics = [#tpu.dimension_semantics<parallel>], iteration_bounds = array<i64: 1>, scalar_prefetch = 0 : i64, scratch_operands = 0 : i64, tpu.core_type = #tpu.core_type<tc>, window_params = [{transform_indices = @transform_0, window_bounds = array<i64: 8, 16>}, {pipeline_mode = #tpu.pipeline_mode<synchronous>, transform_indices = @transform_1, window_bounds = array<i64: 16, 128>}, {pipeline_mode = #tpu.pipeline_mode<synchronous>, transform_indices = @transform_2, window_bounds = array<i64: 1, 128>}, {pipeline_mode = #tpu.pipeline_mode<synchronous>, transform_indices = @transform_3, window_bounds = array<i64: 128, 128>}, {pipeline_mode = #tpu.pipeline_mode<synchronous>, transform_indices = @transform_4, window_bounds = array<i64: 1, 128>}, {pipeline_mode = #tpu.pipeline_mode<synchronous>, transform_indices = @transform_5, window_bounds = array<i64: 128, 128>}, {pipeline_mode = #tpu.pipeline_mode<synchronous>, transform_indices = @transform_6, window_bounds = array<i64: 1, 128>}, {transform_indices = @transform_7, window_bounds = array<i64: 8, 128>}]} {
    %c0 = arith.constant 0 : index
    %c0_0 = arith.constant 0 : index
    %0 = vector.load %arg1[%c0, %c0_0] : memref<8x16xf32, #tpu.memory_space<vmem>>, vector<8x16xf32>
    %c0_1 = arith.constant 0 : index
    %c0_2 = arith.constant 0 : index
    %1 = vector.load %arg2[%c0_1, %c0_2] : memref<16x128xf32, #tpu.memory_space<vmem>>, vector<16x128xf32>
    %cst = arith.constant dense<0.000000e+00> : vector<8x128xf32>
    %2 = tpu.matmul %0, %1, %cst {dimension_numbers = #tpu.dot_dimension_numbers<[1], [0], [0], [1], [0, 0, 1, 1], [], []>} : vector<8x16xf32>, vector<16x128xf32>, vector<8x128xf32> -> vector<8x128xf32>
    %c0_3 = arith.constant 0 : index
    %c0_4 = arith.constant 0 : index
    %3 = vector.load %arg3[%c0_3, %c0_4] : memref<1x128xf32, #tpu.memory_space<vmem>>, vector<1x128xf32>
    %4 = vector.broadcast %3 : vector<1x128xf32> to vector<8x128xf32>
    %5 = arith.addf %2, %4 : vector<8x128xf32>
    %cst_5 = arith.constant 0.000000e+00 : f32
    %6 = vector.broadcast %cst_5 : f32 to vector<8x128xf32>
    %7 = arith.maximumf %5, %6 : vector<8x128xf32>
    %c0_6 = arith.constant 0 : index
    %c0_7 = arith.constant 0 : index
    %8 = vector.load %arg4[%c0_6, %c0_7] : memref<128x128xf32, #tpu.memory_space<vmem>>, vector<128x128xf32>
    %cst_8 = arith.constant dense<0.000000e+00> : vector<8x128xf32>
    %9 = tpu.matmul %7, %8, %cst_8 {dimension_numbers = #tpu.dot_dimension_numbers<[1], [0], [0], [1], [0, 0, 1, 1], [], []>} : vector<8x128xf32>, vector<128x128xf32>, vector<8x128xf32> -> vector<8x128xf32>
    %c0_9 = arith.constant 0 : index
    %c0_10 = arith.constant 0 : index
    %10 = vector.load %arg5[%c0_9, %c0_10] : memref<1x128xf32, #tpu.memory_space<vmem>>, vector<1x128xf32>
    %11 = vector.broadcast %10 : vector<1x128xf32> to vector<8x128xf32>
    %12 = arith.addf %9, %11 : vector<8x128xf32>
    %cst_11 = arith.constant 0.000000e+00 : f32
    %13 = vector.broadcast %cst_11 : f32 to vector<8x128xf32>
    %14 = arith.maximumf %12, %13 : vector<8x128xf32>
    %c0_12 = arith.constant 0 : index
    %c0_13 = arith.constant 0 : index
    %15 = vector.load %arg6[%c0_12, %c0_13] : memref<128x128xf32, #tpu.memory_space<vmem>>, vector<128x128xf32>
    %cst_14 = arith.constant dense<0.000000e+00> : vector<8x128xf32>
    %16 = tpu.matmul %14, %15, %cst_14 {dimension_numbers = #tpu.dot_dimension_numbers<[1], [0], [0], [1], [0, 0, 1, 1], [], []>} : vector<8x128xf32>, vector<128x128xf32>, vector<8x128xf32> -> vector<8x128xf32>
    %c0_15 = arith.constant 0 : index
    %c0_16 = arith.constant 0 : index
    %17 = vector.load %arg7[%c0_15, %c0_16] : memref<1x128xf32, #tpu.memory_space<vmem>>, vector<1x128xf32>
    %18 = vector.broadcast %17 : vector<1x128xf32> to vector<8x128xf32>
    %19 = arith.addf %16, %18 : vector<8x128xf32>
    %20 = tpu.iota {dimensions = array<i32: 1>} : vector<8x128xi32>
    %c64_i32 = arith.constant 64 : i32
    %21 = vector.broadcast %c64_i32 : i32 to vector<8x128xi32>
    %22 = arith.cmpi sge, %20, %21 : vector<8x128xi32>
    %cst_17 = arith.constant -2.000000e+01 : f32
    %cst_18 = arith.constant 2.000000e+00 : f32
    %23 = vector.broadcast %cst_17 : f32 to vector<8x128xf32>
    %24 = arith.maximumf %23, %19 : vector<8x128xf32>
    %25 = vector.broadcast %cst_18 : f32 to vector<8x128xf32>
    %26 = arith.minimumf %25, %24 : vector<8x128xf32>
    %27 = arith.select %22, %26, %19 : vector<8x128xi1>, vector<8x128xf32>
    %c0_19 = arith.constant 0 : index
    %c0_20 = arith.constant 0 : index
    %28 = vector.load %arg8[%c0_19, %c0_20] : memref<8x128xf32, #tpu.memory_space<vmem>>, vector<8x128xf32>
    tpu.vector_store %arg8[%c0_19, %c0_20], %27 {strides = array<i32>} : memref<8x128xf32, #tpu.memory_space<vmem>>, vector<8x128xf32>,
    return
  }
  func.func @transform_0(%arg0: i32) -> (i32, i32) {
    %c0_i32 = arith.constant 0 : i32
    %c0_i32_0 = arith.constant 0 : i32
    return %arg0, %c0_i32 : i32, i32
  }
  func.func @transform_1(%arg0: i32) -> (i32, i32) {
    %c0_i32 = arith.constant 0 : i32
    %c0_i32_0 = arith.constant 0 : i32
    %c0_i32_1 = arith.constant 0 : i32
    return %c0_i32, %c0_i32_0 : i32, i32
  }
  func.func @transform_2(%arg0: i32) -> (i32, i32) {
    %c0_i32 = arith.constant 0 : i32
    %c0_i32_0 = arith.constant 0 : i32
    %c0_i32_1 = arith.constant 0 : i32
    return %c0_i32, %c0_i32_0 : i32, i32
  }
  func.func @transform_3(%arg0: i32) -> (i32, i32) {
    %c0_i32 = arith.constant 0 : i32
    %c0_i32_0 = arith.constant 0 : i32
    %c0_i32_1 = arith.constant 0 : i32
    return %c0_i32, %c0_i32_0 : i32, i32
  }
  func.func @transform_4(%arg0: i32) -> (i32, i32) {
    %c0_i32 = arith.constant 0 : i32
    %c0_i32_0 = arith.constant 0 : i32
    %c0_i32_1 = arith.constant 0 : i32
    return %c0_i32, %c0_i32_0 : i32, i32
  }
  func.func @transform_5(%arg0: i32) -> (i32, i32) {
    %c0_i32 = arith.constant 0 : i32
    %c0_i32_0 = arith.constant 0 : i32
    %c0_i32_1 = arith.constant 0 : i32
    return %c0_i32, %c0_i32_0 : i32, i32
  }
  func.func @transform_6(%arg0: i32) -> (i32, i32) {
    %c0_i32 = arith.constant 0 : i32
    %c0_i32_0 = arith.constant 0 : i32
    %c0_i32_1 = arith.constant 0 : i32
    return %c0_i32, %c0_i32_0 : i32, i32
  }
  func.func @transform_7(%arg0: i32) -> (i32, i32) {
    %c0_i32 = arith.constant 0 : i32
    %c0_i32_0 = arith.constant 0 : i32
    return %arg0, %c0_i32 : i32, i32
  }
}

</mosaic_0001>

<bundles_post_ra>
// kernel: tpu_custom_call.1
= control target key start
LH: loop header
LB: loop body
LE: loop exit
PB: predicated region body
PF: predicated region fallthrough
CT: control target
= control target key end

     0   :  { %12 = vsyncpa [#allocation3], 0  ;;  %s821_s0 = inlined_call_operand.hbm [shape: f32[8,16], index: 0, kind: input, shape index: {}]   ;;  %s822_s1 = inlined_call_operand.hbm [shape: f32[16,128], index: 1, kind: input, shape index: {}]   ;;  %s823_s2 = inlined_call_operand.vmem [shape: f32[1,128], index: 2, kind: input, shape index: {}]   ;;  %s824_s3 = inlined_call_operand.hbm [shape: f32[128,128], index: 3, kind: input, shape index: {}]   ;;  %s825_s4 = inlined_call_operand.vmem [shape: f32[1,128], index: 4, kind: input, shape index: {}]   ;;  %s826_s5 = inlined_call_operand.hbm [shape: f32[128,128], index: 5, kind: input, shape index: {}]   ;;  %s827_s6 = inlined_call_operand.vmem [shape: f32[1,128], index: 6, kind: input, shape index: {}]   ;;  %s828_s7 = inlined_call_operand.hbm [shape: f32[8,128], index: 7, kind: output, shape index: {}]  }
   0x1   :  { %13 = vsyncpa [#allocation6], 0 }
   0x2   :  { %14 = vsyncpa [#allocation9], 0 }
   0x3   :  { %15 = vsyncpa [#allocation4], 0  ;;  %s673_s24 = smov [#allocation5]   ;;  %s555_s28 = scalar_lea.hbm %s822_s1, 256 }
   0x4   :  { %s31_s25 = sshll.u32 %s673_s24, 4  ;;  %p556_p0 = scmp.ne.s32.totalorder %s822_s1, %s555_s28  ;;  %s32_s25 = int_to_ptr.vmem [resolvable:$true] %s31_s25 }
   0x5   :  { %p559_p1 = scmp.lt.u32.totalorder %s555_s28, %s822_s1 }
   0x7   :  { %p561_p2 = pnand %p559_p1, %p556_p0 }
   0x9   :  { %564 = shalt.err (!%p561_p2)
}
   0xa   :  { %s565_s10 = scalar_lea.vmem %s32_s25, 256  ;;  %p570_p4 = scmp.lt.s32.totalorder %s32_s25, %s32_s25 }
   0xb   :  { %p566_p3 = scmp.ne.s32.totalorder %s32_s25, %s565_s10  ;;  %p571_p5 = scmp.lt.s32.totalorder %s565_s10, %s565_s10 }
   0xd   :  { %p572_p6 = por %p571_p5, %p570_p4 }
   0xf   :  { %p573_p7 = pnand %p572_p6, %p566_p3 }
  0x11   :  { %576 = shalt.err (!%p573_p7)
}
  0x12   :  { %s674_s11 = smov 128   ;;  %s675_s12 = smov 8  }
  0x13   :  { %37 = dma.hbm_to_vmem [thread:$0]  %s822_s1, 256, %s32_s25, [#allocation6], %s674_s11, %s674_s11, %s675_s12  }
  0x14   :  { %s676_s15 = smov [#allocation2]   ;;  %s677_s17 = smov [#allocation7]  }
  0x15   :  { %s22_s16 = sshll.u32 %s676_s15, 4  ;;  %s45_s18 = sshll.u32 %s677_s17, 4  ;;  %s23_s16 = int_to_ptr.vmem [resolvable:$true] %s22_s16  ;;  %s46_s18 = int_to_ptr.vmem [resolvable:$true] %s45_s18 }
  0x16   :  { %s577_s21 = scalar_lea.hbm %s821_s0, 128 }
  0x17   :  { %p578_p8 = scmp.ne.s32.totalorder %s821_s0, %s577_s21  ;;  %p581_p9 = scmp.lt.u32.totalorder %s577_s21, %s821_s0 }
  0x19   :  { %p583_p10 = pnand %p581_p9, %p578_p8 }
  0x1b   :  { %586 = shalt.err (!%p583_p10)
}
  0x1c   :  { %s587_s1 = scalar_lea.vmem %s23_s16, 128  ;;  %p592_p12 = scmp.lt.s32.totalorder %s23_s16, %s23_s16 }
  0x1d   :  { %p588_p11 = scmp.ne.s32.totalorder %s23_s16, %s587_s1  ;;  %p593_p13 = scmp.lt.s32.totalorder %s587_s1, %s587_s1 }
  0x1f   :  { %p594_p0 = por %p593_p13, %p592_p12 }
  0x21   :  { %p595_p1 = pnand %p594_p0, %p588_p11 }
  0x23   :  { %598 = shalt.err (!%p595_p1)
}
  0x24   :  { %25 = dma.hbm_to_vmem [thread:$0]  %s821_s0, 128, %s23_s16, [#allocation3]  }
  0x25   :  { %s599_s30 = scalar_lea.hbm %s824_s3, 2048 }
  0x26   :  { %p600_p2 = scmp.ne.s32.totalorder %s824_s3, %s599_s30  ;;  %p603_p3 = scmp.lt.u32.totalorder %s599_s30, %s824_s3 }
  0x28   :  { %p605_p4 = pnand %p603_p3, %p600_p2 }
  0x2a   :  { %608 = shalt.err (!%p605_p4)
}
  0x2b   :  { %s609_s14 = scalar_lea.vmem %s46_s18, 2048  ;;  %p614_p6 = scmp.lt.s32.totalorder %s46_s18, %s46_s18 }
  0x2c   :  { %p610_p5 = scmp.ne.s32.totalorder %s46_s18, %s609_s14  ;;  %p615_p7 = scmp.lt.s32.totalorder %s609_s14, %s609_s14 }
  0x2e   :  { %p616_p8 = por %p615_p7, %p614_p6 }
  0x30   :  { %p617_p9 = pnand %p616_p8, %p610_p5 }
  0x32   :  { %620 = shalt.err (!%p617_p9)
}
  0x33   :  { %51 = dma.hbm_to_vmem [thread:$0]  %s824_s3, 2048, %s46_s18, [#allocation6], %s674_s11, %s674_s11, %s675_s12  }
  0x34   :  { %s678_s16 = smov [#allocation8]   ;;  %s621_s21 = scalar_lea.hbm %s826_s5, 2048 }
  0x35   :  { %s59_s17 = sshll.u32 %s678_s16, 4  ;;  %p622_p10 = scmp.ne.s32.totalorder %s826_s5, %s621_s21  ;;  %s60_s17 = int_to_ptr.vmem [resolvable:$true] %s59_s17 }
  0x36   :  { %p625_p11 = scmp.lt.u32.totalorder %s621_s21, %s826_s5 }
  0x38   :  { %p627_p12 = pnand %p625_p11, %p622_p10 }
  0x3a   :  { %630 = shalt.err (!%p627_p12)
}
  0x3b   :  { %s631_s1 = scalar_lea.vmem %s60_s17, 2048  ;;  %p636_p0 = scmp.lt.s32.totalorder %s60_s17, %s60_s17 }
  0x3c   :  { %p632_p13 = scmp.ne.s32.totalorder %s60_s17, %s631_s1  ;;  %p637_p1 = scmp.lt.s32.totalorder %s631_s1, %s631_s1 }
  0x3e   :  { %p638_p2 = por %p637_p1, %p636_p0 }
  0x40   :  { %p639_p3 = pnand %p638_p2, %p632_p13 }
  0x42   :  { %642 = shalt.err (!%p639_p3)
}
  0x43   :  { %65 = dma.hbm_to_vmem [thread:$0]  %s826_s5, 2048, %s60_s17, [#allocation9], %s674_s11, %s674_s11, %s675_s12  }
  0x44   :  { %665 = dma.done.wait [#allocation3], 128  }
  0x45   :  { %666 = vsyncadd [#allocation3], 4294967168 }
  0x46   :  { %667 = dma.done.wait [#allocation6], 2304  }
  0x47   :  { %668 = vsyncadd [#allocation6], 4294964992 }
  0x48   :  { %669 = dma.done.wait [#allocation9], 2048  }
  0x49   :  { %670 = vsyncadd [#allocation9], 4294965248  ;;  %v679_v0 = vmov 0.0|0.0   ;;  %vm680_vm0 = vmmov 0   ;;  %v681_v1 = vmov 0.0   ;;  %v81_v2 = vld [vmem:[#allocation5] sm:$0xff] }
  0x4a   :  { %494 = vmatprep.subr.bf16.mxu0 %v679_v0  ;;  %421 = vmatprep.mubr.msk.f32.mxu0 %vm680_vm0, %v681_v1  ;;  %v82_v3 = vld [vmem:[#allocation5 + $0x8] sm:$0xff]  ;;  %v165_v5 = vld [vmem:[#allocation7] sm:$0xff]  ;;  %v166_v6 = vld [vmem:[#allocation7 + $0x8] sm:$0xff]  ;;  %vm90_vm1 = vcmask 130048   ;;  %s682_s28 = smov [#allocation10]  }
  0x4b   :  { %497 = vmatprep.subr.bf16.mxu1 %v679_v0  ;;  %456 = vmatprep.mubr.msk.f32.mxu1 %vm680_vm0, %v681_v1  ;;  %v495_v4 = vpack.c.bf16 %v82_v3, %v81_v2  ;;  %v167_v7 = vld [vmem:[#allocation7 + $0x10] sm:$0xff]  ;;  %v498_v8 = vpack.c.bf16 %v166_v6, %v165_v5  ;;  %v168_v9 = vld [vmem:[#allocation7 + $0x18] sm:$0xff]  ;;  %v80_v10 = vld [vmem:[#allocation2] sm:$0xff]  ;;  %s365_s29 = sshll.u32 %s682_s28, 4  ;;  %s366_s29 = int_to_ptr.vmem [resolvable:$true] %s365_s29 }
  0x4c   :  { %v501_v11 = vpack.c.bf16 %v168_v9, %v167_v7  ;;  %v169_v12 = vld [vmem:[#allocation7 + $0x20] sm:$0xff]  ;;  %v170_v13 = vld [vmem:[#allocation7 + $0x28] sm:$0xff]  ;;  %v171_v15 = vld [vmem:[#allocation7 + $0x30] sm:$0xff]  ;;  %p648_p5 = scmp.lt.s32.totalorder %s366_s29, %s366_s29 }
  0x4d   :  { %496 = vmatpush3.bf16.msra.mxu0 %v495_v4  ;;  %499 = vmatpush3.bf16.msra.mxu1 %v498_v8  ;;  %v504_v14 = vpack.c.bf16 %v170_v13, %v169_v12  ;;  %v172_v16 = vld [vmem:[#allocation7 + $0x38] sm:$0xff]  ;;  %v173_v18 = vld [vmem:[#allocation7 + $0x40] sm:$0xff]  ;;  %v174_v19 = vld [vmem:[#allocation7 + $0x48] sm:$0xff] }
  0x4e   :  { %521 = vmatprep.subr.bf16.mxu0 %v679_v0  ;;  %500 = vmatprep.subr.bf16.mxu1 %v679_v0  ;;  %v507_v17 = vpack.c.bf16 %v172_v16, %v171_v15  ;;  %v510_v20 = vpack.c.bf16 %v174_v19, %v173_v18  ;;  %v175_v21 = vld [vmem:[#allocation7 + $0x50] sm:$0xff]  ;;  %v176_v22 = vld [vmem:[#allocation7 + $0x58] sm:$0xff]  ;;  %v177_v24 = vld [vmem:[#allocation7 + $0x60] sm:$0xff] }
  0x4f   :  { %v513_v23 = vpack.c.bf16 %v176_v22, %v175_v21  ;;  %v178_v25 = vld [vmem:[#allocation7 + $0x68] sm:$0xff]  ;;  %v179_v27 = vld [vmem:[#allocation7 + $0x70] sm:$0xff]  ;;  %v180_v28 = vld [vmem:[#allocation7 + $0x78] sm:$0xff] }
  0x50   :  { %422 = vmatmul.mubr.msk.f32.vlgmr.msra.gmra.mrb[0].mxu0 %vm90_vm1, %v80_v10  ;;  %v516_v26 = vpack.c.bf16 %v178_v25, %v177_v24  ;;  %v519_v29 = vpack.c.bf16 %v180_v28, %v179_v27  ;;  %v259_v30 = vld [vmem:[#allocation8] sm:$0xff]  ;;  %v260_v31 = vld [vmem:[#allocation8 + $0x8] sm:$0xff]  ;;  %v261_v32 = vld [vmem:[#allocation8 + $0x10] sm:$0xff] }
  0x51   :  { %491 = vmatprep.mubr.msk.f32.mxu0 %vm680_vm0, %v681_v1  ;;  %502 = vmatpush3.bf16.msra.mxu1 %v501_v11  ;;  %v522_v33 = vpack.c.bf16 %v260_v31, %v259_v30  ;;  %v262_v34 = vld [vmem:[#allocation8 + $0x18] sm:$0xff]  ;;  %v263_v36 = vld [vmem:[#allocation8 + $0x20] sm:$0xff]  ;;  %v264_v37 = vld [vmem:[#allocation8 + $0x28] sm:$0xff] }
  0x52   :  { %503 = vmatprep.subr.bf16.mxu1 %v679_v0  ;;  %v525_v35 = vpack.c.bf16 %v262_v34, %v261_v32  ;;  %v528_v38 = vpack.c.bf16 %v264_v37, %v263_v36  ;;  %v265_v39 = vld [vmem:[#allocation8 + $0x30] sm:$0xff]  ;;  %v266_v40 = vld [vmem:[#allocation8 + $0x38] sm:$0xff]  ;;  %v267_v42 = vld [vmem:[#allocation8 + $0x40] sm:$0xff] }
  0x53   :  { %523 = vmatpush3.bf16.msra.mxu0 %v522_v33  ;;  %v531_v41 = vpack.c.bf16 %v266_v40, %v265_v39  ;;  %v268_v43 = vld [vmem:[#allocation8 + $0x48] sm:$0xff]  ;;  %v269_v45 = vld [vmem:[#allocation8 + $0x50] sm:$0xff]  ;;  %v270_v46 = vld [vmem:[#allocation8 + $0x58] sm:$0xff] }
  0x54   :  { %524 = vmatprep.subr.bf16.mxu0 %v679_v0  ;;  %v534_v44 = vpack.c.bf16 %v268_v43, %v267_v42  ;;  %v537_v47 = vpack.c.bf16 %v270_v46, %v269_v45  ;;  %v271_v48 = vld [vmem:[#allocation8 + $0x60] sm:$0xff]  ;;  %v272_v49 = vld [vmem:[#allocation8 + $0x68] sm:$0xff]  ;;  %v273_v56 = vld [vmem:[#allocation8 + $0x70] sm:$0xff] }
  0x55   :  { %505 = vmatpush3.bf16.msra.mxu1 %v504_v14  ;;  %v540_v50 = vpack.c.bf16 %v272_v49, %v271_v48  ;;  %v376_v51 = vld [vmem:[%s823_s2] ss:$0 sm:$0xff]  ;;  %v274_v57 = vld [vmem:[#allocation8 + $0x78] sm:$0xff] }
  0x56   :  { %506 = vmatprep.subr.bf16.mxu1 %v679_v0  ;;  %v543_v58 = vpack.c.bf16 %v274_v57, %v273_v56  ;;  %v378_v59 = vld [vmem:[%s825_s4] ss:$0 sm:$0xff]  ;;  %s643_s4 = scalar_lea.vmem %s366_s29, 128 }
  0x57   :  { %526 = vmatpush3.bf16.msra.mxu0 %v525_v35  ;;  %v379_v1 = vld [vmem:[%s827_s6] ss:$0 sm:$0xff]  ;;  %p644_p4 = scmp.ne.s32.totalorder %s366_s29, %s643_s4  ;;  %p649_p6 = scmp.lt.s32.totalorder %s643_s4, %s643_s4 }
  0x58   :  { %527 = vmatprep.subr.bf16.mxu0 %v679_v0 }
  0x59   :  { %508 = vmatpush3.bf16.msra.mxu1 %v507_v17  ;;  %p650_p7 = por %p649_p6, %p648_p5 }
  0x5a   :  { %509 = vmatprep.subr.bf16.mxu1 %v679_v0 }
  0x5b   :  { %529 = vmatpush3.bf16.msra.mxu0 %v528_v38  ;;  %p651_p8 = pnand %p650_p7, %p644_p4 }
  0x5c   :  { %530 = vmatprep.subr.bf16.mxu0 %v679_v0 }
  0x5d   :  { %511 = vmatpush3.bf16.msra.mxu1 %v510_v20 }
  0x5e   :  { %512 = vmatprep.subr.bf16.mxu1 %v679_v0 }
  0x5f   :  { %532 = vmatpush3.bf16.msra.mxu0 %v531_v41 }
  0x60   :  { %533 = vmatprep.subr.bf16.mxu0 %v679_v0 }
  0x61   :  { %514 = vmatpush3.bf16.msra.mxu1 %v513_v23 }
  0x62   :  { %515 = vmatprep.subr.bf16.mxu1 %v679_v0 }
  0x63   :  { %535 = vmatpush3.bf16.msra.mxu0 %v534_v44 }
  0x64   :  { %536 = vmatprep.subr.bf16.mxu0 %v679_v0 }
  0x65   :  { %517 = vmatpush3.bf16.msra.mxu1 %v516_v26 }
  0x66   :  { %518 = vmatprep.subr.bf16.mxu1 %v679_v0 }
  0x67   :  { %538 = vmatpush3.bf16.msra.mxu0 %v537_v47 }
  0x68   :  { %539 = vmatprep.subr.bf16.mxu0 %v679_v0 }
  0x69   :  { %520 = vmatpush3.bf16.msra.mxu1 %v519_v29 }
  0x6b   :  { %541 = vmatpush3.bf16.msra.mxu0 %v540_v50 }
  0x6c   :  { %542 = vmatprep.subr.bf16.mxu0 %v679_v0  ;;  %v352_v0 = vlaneseq }
  0x6e   :  { %v353_v3 = vand.u32 127, %v352_v0 }
  0x6f   :  { %544 = vmatpush3.bf16.msra.mxu0 %v543_v58 }
  0x70   :  { %vm354_vm2 = vcmp.ge.s32.totalorder %v353_v3, 64 }
 0x123   :  { %v160_v52 = vpop.f32.mrb[0].mxu0 }
 0x124   :  { %v161_v53 = vadd.f32 %v376_v51, %v160_v52  ;;  %v423_v54 = vpop.f32.mrb[1].mxu0 }
 0x126   :  { %v164_v55 = vmax.f32 %v161_v53, 0.0 }
 0x128   :  { %457 = vmatmul.mubr.f32.vlgmr.msra.gmra.mrb[0].mxu1 %v164_v55 }
 0x1fb   :  { %v254_v60 = vpop.f32.mrb[0].mxu1 }
 0x1fc   :  { %v255_v61 = vadd.f32 %v378_v59, %v254_v60  ;;  %v458_v62 = vpop.f32.mrb[1].mxu1 }
 0x1fe   :  { %v258_v63 = vmax.f32 %v255_v61, 0.0 }
 0x200   :  { %492 = vmatmul.mubr.f32.vlgmr.msra.gmra.mrb[2].mxu0 %v258_v63 }
 0x2d3   :  { %v348_v2 = vpop.f32.mrb[2].mxu0 }
 0x2d4   :  { %v349_v4 = vadd.f32 %v379_v1, %v348_v2  ;;  %v493_v5 = vpop.f32.mrb[3].mxu0 }
 0x2d6   :  { %v355_v6 = vmax.f32 %v349_v4, -20.0 }
 0x2d8   :  { %v356_v7 = vmin.f32 %v355_v6, 2.0 }
 0x2da   :  { %v357_v8 = vsel %vm354_vm2, %v356_v7, %v349_v4 }
 0x2db   :  { %358 = vst [vmem:[#allocation10] sm:$0xff] %v357_v8 }
 0x2dc   :  { %654 = shalt.err (!%p651_p8)
}
 0x2dd   :  { %s655_s8 = scalar_lea.hbm %s828_s7, 128 }
 0x2de   :  { %p656_p9 = scmp.ne.s32.totalorder %s828_s7, %s655_s8  ;;  %p659_p10 = scmp.lt.u32.totalorder %s655_s8, %s828_s7 }
 0x2e0   :  { %p661_p11 = pnand %p659_p10, %p656_p9 }
 0x2e2   :  { %664 = shalt.err (!%p661_p11)
}
 0x2e3   :  { %368 = dma.vmem_to_hbm [thread:$0]  %s366_s29, 128, %s828_s7, [#allocation4]  }
 0x2e4   :  { %671 = dma.done.wait [#allocation4], 128  }
 0x2e5   :  { %672 = vsyncadd [#allocation4], 4294967168 }
 0x2e6   :  { %372 = vsyncpa [#allocation3], 1 }
 0x2e7   :  { %373 = vsyncpa [#allocation6], 1 }
 0x2e8   :  { %374 = vsyncpa [#allocation9], 1 }
 0x2e9   :  { %375 = vsyncpa [#allocation4], 1 }

</bundles_post_ra>
